<compile_context>
chip_gen: v5e
topology: v5e:2x2
jax: 0.10.0
libtpu: 0.0.40
codegen_flags: <defaults>
</compile_context>

<pallas_src>
import functools

import jax
import jax.numpy as jnp
from jax import lax
from jax.experimental import pallas as pl
from jax.experimental.pallas import tpu as pltpu


def _round_up(x: int, m: int) -> int:
    return ((x + m - 1) // m) * m


def _gram_kernel_single(x_ref, gram_ref, *, inv_norm):
    """Single-input path (all rows fit one block).  Grid: (pixel-tiles,)."""
    k = pl.program_id(0)

    @pl.when(k == 0)
    def _():
        gram_ref[...] = jnp.zeros_like(gram_ref)

    x = x_ref[...]  # (n_pad, tk)
    # Contract the last dim of both operands -> (n_pad, n_pad), f32 accumulate.
    gram_ref[...] += lax.dot_general(
        x, x,
        dimension_numbers=(((1,), (1,)), ((), ())),
        preferred_element_type=jnp.float32,
    )

    @pl.when(k == pl.num_programs(0) - 1)
    def _():
        gram_ref[...] *= inv_norm


def _gram_kernel_blocked(rows_ref, cols_ref, gram_ref, *, inv_norm):
    """Row-blocked path.  Grid: (row-block i [parallel], pixel-tile k [arbitrary])."""
    k = pl.program_id(1)

    @pl.when(k == 0)
    def _():
        gram_ref[...] = jnp.zeros_like(gram_ref)

    # rows (tn, tk) x cols (n_pad, tk) contracted on last dim -> (tn, n_pad).
    gram_ref[...] += lax.dot_general(
        rows_ref[...],
        cols_ref[...],
        dimension_numbers=(((1,), (1,)), ((), ())),
        preferred_element_type=jnp.float32,
    )

    @pl.when(k == pl.num_programs(1) - 1)
    def _():
        gram_ref[...] *= inv_norm


def _pick_tk(bytes_per_k_col: int, budget: int, M: int) -> int:
    """Largest K tile from a fixed candidate list that fits the VMEM budget."""
    tk = 128
    for cand in (2048, 1024, 512, 256, 128):
        if cand * bytes_per_k_col <= budget:
            tk = cand
            break
    if M < tk:
        tk = _round_up(max(M, 1), 128)
    return tk


def _gram_pallas(features, norm: float):
    """features: (N, M) -> gram (N, N) float32, already divided by `norm`."""
    N, M = features.shape
    itemsize = jnp.dtype(features.dtype).itemsize
    budget = 12 * 1024 * 1024  # conservative VMEM budget (v5e default-safe)
    inv_norm = 1.0 / float(norm)

    n8 = _round_up(N, 8)

    if n8 <= 256:
        # ---------------- single row-block path ----------------
        n_pad = n8
        # per-K-column VMEM cost: double-buffered (n_pad, tk) input.
        out_bytes = n_pad * n_pad * 4
        tk = _pick_tk(2 * n_pad * itemsize, budget - out_bytes, M)
        m_pad = _round_up(M, tk)
        if n_pad != N or m_pad != M:
            features = jnp.pad(features, ((0, n_pad - N), (0, m_pad - M)))

        kernel = functools.partial(_gram_kernel_single, inv_norm=inv_norm)
        gram = pl.pallas_call(
            kernel,
            out_shape=jax.ShapeDtypeStruct((n_pad, n_pad), jnp.float32),
            grid_spec=pltpu.PrefetchScalarGridSpec(
                num_scalar_prefetch=0,
                grid=(m_pad // tk,),
                in_specs=[pl.BlockSpec((n_pad, tk), lambda k: (0, k))],
                out_specs=pl.BlockSpec((n_pad, n_pad), lambda k: (0, 0)),
            ),
            compiler_params=pltpu.CompilerParams(
                dimension_semantics=("arbitrary",),
            ),
        )(features)
    else:
        # ---------------- row-blocked path (large N) ----------------
        tn = 256
        n_pad = _round_up(n8, tn)
        out_bytes = tn * n_pad * 4
        # per-K-column cost: double-buffered row block + double-buffered all-rows block.
        tk = _pick_tk(2 * (tn + n_pad) * itemsize, budget - out_bytes, M)
        m_pad = _round_up(M, tk)
        if n_pad != N or m_pad != M:
            features = jnp.pad(features, ((0, n_pad - N), (0, m_pad - M)))

        kernel = functools.partial(_gram_kernel_blocked, inv_norm=inv_norm)
        gram = pl.pallas_call(
            kernel,
            out_shape=jax.ShapeDtypeStruct((n_pad, n_pad), jnp.float32),
            grid_spec=pltpu.PrefetchScalarGridSpec(
                num_scalar_prefetch=0,
                grid=(n_pad // tn, m_pad // tk),
                in_specs=[
                    pl.BlockSpec((tn, tk), lambda i, k: (i, k)),      # row block
                    pl.BlockSpec((n_pad, tk), lambda i, k: (0, k)),   # all rows
                ],
                out_specs=pl.BlockSpec((tn, n_pad), lambda i, k: (i, 0)),
            ),
            compiler_params=pltpu.CompilerParams(
                dimension_semantics=("parallel", "arbitrary"),
            ),
        )(features, features)

    return gram[:N, :N]


def gram_matrix(x):
    """Pallas-backed equivalent of the PyTorch gram_matrix()."""
    a, b, c, d = x.shape
    feats = x.reshape(a * b, c * d)  # keep incoming dtype (bf16 stays bf16)
    return _gram_pallas(feats, norm=float(a * b * c * d))


class StyleLoss:
    """JAX/Pallas port of the PyTorch StyleLoss module."""

    def __init__(self, target_feature):
        self.target = gram_matrix(target_feature)  # "detached" by construction
        self.loss = None

    def __call__(self, predict):
        gram = gram_matrix(predict)
        # Tiny (N, N) MSE epilogue in plain JAX (cheaper than an in-kernel
        # resident target + masked (1,1) store).
        self.loss = jnp.mean((gram - self.target) ** 2)
        return predict  # forward returns the input unchanged, like PyTorch


def _reference(predict, target_feature):
    """Pure-JAX reference for correctness checking."""
    def gm(x):
        a, b, c, d = x.shape
        f = x.reshape(a * b, c * d).astype(jnp.float32)
        return (f @ f.T) / (a * b * c * d)

    g_p = gm(predict)
    g_t = gm(target_feature)
    return jnp.mean((g_p - g_t) ** 2)


if __name__ == "__main__":
    key = jax.random.PRNGKey(0)
    k1, k2 = jax.random.split(key)
    # Small NCHW shapes: batch=2, channels=4, spatial=16  ->  features (8, 256)
    predict = jax.random.normal(k1, (2, 4, 16, 16), dtype=jnp.float32)
    target_feature = jax.random.normal(k2, (2, 4, 16, 16), dtype=jnp.float32)

    style = StyleLoss(target_feature)
    out = style(predict)
    jax.block_until_ready(out)
    jax.block_until_ready(style.loss)

    ref_loss = _reference(predict, target_feature)
    assert out.shape == predict.shape
    assert jnp.allclose(style.loss, ref_loss, rtol=1e-5, atol=1e-6), (
        style.loss, ref_loss
    )
    print("KERNEL_OK")
</pallas_src>

<mosaic_0001>
module attributes {stable_mosaic.version = 11 : i64} {
  func.func @_gram_kernel_single(%arg0: i32, %arg1: memref<8x256xf32, #tpu.memory_space<vmem>>, %arg2: memref<8x8xf32, #tpu.memory_space<vmem>>) attributes {dimension_semantics = [#tpu.dimension_semantics<arbitrary>], iteration_bounds = array<i64: 1>, scalar_prefetch = 0 : i64, scratch_operands = 0 : i64, tpu.core_type = #tpu.core_type<tc>, window_params = [{transform_indices = @transform_0, window_bounds = array<i64: 8, 256>}, {pipeline_mode = #tpu.pipeline_mode<synchronous>, transform_indices = @transform_1, window_bounds = array<i64: 8, 8>}]} {
    %c0_i32 = arith.constant 0 : i32
    %0 = arith.cmpi eq, %arg0, %c0_i32 : i32
    %1 = arith.extui %0 : i1 to i32
    %c0_i32_0 = arith.constant 0 : i32
    %2 = arith.cmpi ne, %1, %c0_i32_0 : i32
    scf.if %2 {
      %cst_8 = arith.constant 0.000000e+00 : f32
      %11 = vector.broadcast %cst_8 : f32 to vector<8x8xf32>
      %c0_9 = arith.constant 0 : index
      %c0_10 = arith.constant 0 : index
      %12 = vector.load %arg2[%c0_9, %c0_10] : memref<8x8xf32, #tpu.memory_space<vmem>>, vector<8x8xf32>
      tpu.vector_store %arg2[%c0_9, %c0_10], %11 {strides = array<i32>} : memref<8x8xf32, #tpu.memory_space<vmem>>, vector<8x8xf32>,
    } else {
    }
    %c0 = arith.constant 0 : index
    %c0_1 = arith.constant 0 : index
    %3 = vector.load %arg1[%c0, %c0_1] : memref<8x256xf32, #tpu.memory_space<vmem>>, vector<8x256xf32>
    %c0_2 = arith.constant 0 : index
    %c0_3 = arith.constant 0 : index
    %4 = vector.load %arg2[%c0_2, %c0_3] : memref<8x8xf32, #tpu.memory_space<vmem>>, vector<8x8xf32>
    %cst = arith.constant dense<0.000000e+00> : vector<8x8xf32>
    %5 = tpu.matmul %3, %3, %cst {dimension_numbers = #tpu.dot_dimension_numbers<[1], [1], [0], [0], [0, 0, 1, 0], [], []>} : vector<8x256xf32>, vector<8x256xf32>, vector<8x8xf32> -> vector<8x8xf32>
    %6 = arith.addf %4, %5 : vector<8x8xf32>
    %c0_4 = arith.constant 0 : index
    %c0_5 = arith.constant 0 : index
    %7 = vector.load %arg2[%c0_4, %c0_5] : memref<8x8xf32, #tpu.memory_space<vmem>>, vector<8x8xf32>
    tpu.vector_store %arg2[%c0_4, %c0_5], %6 {strides = array<i32>} : memref<8x8xf32, #tpu.memory_space<vmem>>, vector<8x8xf32>,
    %c0_i32_6 = arith.constant 0 : i32
    %8 = arith.cmpi eq, %arg0, %c0_i32_6 : i32
    %9 = arith.extui %8 : i1 to i32
    %c0_i32_7 = arith.constant 0 : i32
    %10 = arith.cmpi ne, %9, %c0_i32_7 : i32
    scf.if %10 {
      %c0_8 = arith.constant 0 : index
      %c0_9 = arith.constant 0 : index
      %11 = vector.load %arg2[%c0_8, %c0_9] : memref<8x8xf32, #tpu.memory_space<vmem>>, vector<8x8xf32>
      %cst_10 = arith.constant 4.8828125E-4 : f32
      %12 = vector.broadcast %cst_10 : f32 to vector<8x8xf32>
      %13 = arith.mulf %11, %12 : vector<8x8xf32>
      %c0_11 = arith.constant 0 : index
      %c0_12 = arith.constant 0 : index
      %14 = vector.load %arg2[%c0_11, %c0_12] : memref<8x8xf32, #tpu.memory_space<vmem>>, vector<8x8xf32>
      tpu.vector_store %arg2[%c0_11, %c0_12], %13 {strides = array<i32>} : memref<8x8xf32, #tpu.memory_space<vmem>>, vector<8x8xf32>,
    } else {
    }
    return
  }
  func.func @transform_0(%arg0: i32) -> (i32, i32) {
    %c0_i32 = arith.constant 0 : i32
    %c0_i32_0 = arith.constant 0 : i32
    return %c0_i32, %arg0 : i32, i32
  }
  func.func @transform_1(%arg0: i32) -> (i32, i32) {
    %c0_i32 = arith.constant 0 : i32
    %c0_i32_0 = arith.constant 0 : i32
    %c0_i32_1 = arith.constant 0 : i32
    return %c0_i32, %c0_i32_0 : i32, i32
  }
}

</mosaic_0001>

<bundles_post_ra>
// kernel: tpu_custom_call.1
= control target key start
LH: loop header
LB: loop body
LE: loop exit
PB: predicated region body
PF: predicated region fallthrough
CT: control target
= control target key end

     0   :  { %6 = vsyncpa [#allocation3], 0  ;;  %s175_s0 = inlined_call_operand.hbm [shape: f32[8,256], index: 0, kind: input, shape index: {}]   ;;  %s176_s1 = inlined_call_operand.hbm [shape: f32[8,8], index: 1, kind: output, shape index: {}]  }
   0x1   :  { %7 = vsyncpa [#allocation4], 0  ;;  %s13_s8 = sshll.u32 %s175_s0, 4  ;;  %s153_s9 = smov [#allocation2]   ;;  %s14_s8 = int_to_ptr.hbm [resolvable:$true] %s13_s8 }
   0x2   :  { %s15_s10 = sshll.u32 %s153_s9, 4  ;;  %s16_s10 = int_to_ptr.vmem [resolvable:$true] %s15_s10 }
   0x3   :  { %18 = dma.hbm_to_vmem [thread:$0]  %s14_s8, 256, %s16_s10, [#allocation3]  }
   0x4   :  { %149 = dma.done.wait [#allocation3], 256  }
   0x5   :  { %150 = vsyncadd [#allocation3], 4294967040  ;;  %v29_v0 = vld [vmem:[#allocation2] sm:$0xff]  ;;  %v30_v1 = vld [vmem:[#allocation2 + $0x8] sm:$0xff]  ;;  %vm27_vm0 = vcmask 64512   ;;  %v154_v2 = vmov 0.0  }
   0x6   :  { %47 = vmatpush.xpose.msra.mxu0 %v29_v0  ;;  %67 = vmatpush.xpose.msra.mxu1 %v30_v1  ;;  %28 = vst.msk [vmem:[#allocation5] sm:$0xff] %vm27_vm0, %v154_v2  ;;  %s155_s0 = smov [#allocation5]   ;;  %s88_s14 = sshll.u32 %s176_s1, 4  ;;  %s89_s14 = int_to_ptr.hbm [resolvable:$true] %s88_s14 }
   0x7   :  { %s86_s11 = sshll.u32 %s155_s0, 4  ;;  %s87_s11 = int_to_ptr.vmem [resolvable:$true] %s86_s11 }
   0x9   :  { %48 = vmatmul.f32.vlgmr.msra.gmra.mxu0 %v29_v0  ;;  %68 = vmatmul.f32.vlgmr.msra.gmra.mxu1 %v30_v1 }
   0xd   :  { %v31_v4 = vld [vmem:[#allocation5] sm:$0xff] }
  0x86   :  { %v49_v3 = vpop.f32.mrf.mxu0  ;;  %v69_v5 = vpop.f32.mrf.mxu1 }
  0x87   :  { %v70_v6 = vadd.f32 %v69_v5, %v49_v3 }
  0x89   :  { %v72_v7 = vadd.f32 %v70_v6, %v31_v4 }
  0x8b   :  { %74 = vst.msk [vmem:[#allocation5] sm:$0xff] %vm27_vm0, %v72_v7 }
  0x92   :  { %v78_v8 = vld [vmem:[#allocation5] sm:$0xff] }
  0x93   :  { %v79_v9 = vmul.f32 0.00048828125, %v78_v8 }
  0x95   :  { %80 = vst.msk [vmem:[#allocation5] sm:$0xff] %vm27_vm0, %v79_v9 }
  0x96   :  { %91 = dma.vmem_to_hbm [thread:$0]  %s87_s11, 128, %s89_s14, [#allocation4]  }
  0x97   :  { %151 = dma.done.wait [#allocation4], 128  }
  0x98   :  { %152 = vsyncadd [#allocation4], 4294967168 }
  0x99   :  { %96 = vsyncpa [#allocation3], 1 }
  0x9a   :  { %97 = vsyncpa [#allocation4], 1 }

</bundles_post_ra>
